<compile_context>
chip_gen: v5e
topology: v5e:2x2
jax: 0.10.0
libtpu: 0.0.40
codegen_flags: <defaults>
</compile_context>

<pallas_src>
import jax
import jax.numpy as jnp
from jax.experimental import pallas as pl
from jax.experimental.pallas import tpu as pltpu


def policy_net_kernel(xT_ref, w1_ref, b1_ref, w2_ref, b2_ref, outT_ref):
    # fc1: h^T = W1 @ x^T + b1   ; W1: [H, S] (PyTorch layout), x^T: [S, TB]
    hT = jnp.dot(w1_ref[...], xT_ref[...],
                 preferred_element_type=jnp.float32) + b1_ref[...]
    hT = jnp.maximum(hT, 0.0)

    # fc2: logits^T = W2 @ h^T + b2   ; W2: [A, H] -> [A, TB]
    logitsT = jnp.dot(w2_ref[...], hT,
                      preferred_element_type=jnp.float32) + b2_ref[...]

    # Numerically-stable softmax over the action (sublane) axis.
    m = jnp.max(logitsT, axis=0, keepdims=True)
    e = jnp.exp(logitsT - m)
    denom = jnp.sum(e, axis=0, keepdims=True)
    # Exact divide (NOT approx reciprocal) so probabilities sum to 1 exactly
    # up to f32 rounding; VALU has plenty of slack here.
    outT_ref[...] = (e / denom).astype(outT_ref.dtype)


def _round_up(n, m):
    return ((n + m - 1) // m) * m


def policy_net_forward(x, w1, b1, w2, b2, *, batch_tile=8192, core_parallel=False):
    """PolicyNet forward.

    x : [B, state_dim]
    w1: [hidden_dim, state_dim]   (PyTorch nn.Linear layout)
    b1: [hidden_dim]
    w2: [action_dim, hidden_dim]
    b2: [action_dim]
    returns probs: [B, action_dim]
    """
    batch, state_dim = x.shape
    hidden_dim = w1.shape[0]
    action_dim = w2.shape[0]
    out_dtype = x.dtype
    itemsize = jnp.dtype(x.dtype).itemsize

    # Batch-on-lanes layout: [S, B] in, [A, B] out (lane-dense loads/stores).
    xT = x.T
    b1c = b1.reshape(hidden_dim, 1)
    b2c = b2.reshape(action_dim, 1)

    # Batch tile on the lane axis. Small batches use a single full-array block
    # (exact, no masking); large batches use 128-aligned tiles with a ragged,
    # masked final tile -- no wrapper pad/slice copies.
    if batch <= 128:
        tb = batch
    else:
        tb = min(_round_up(batch_tile, 128), (batch // 128) * 128)
    grid = (pl.cdiv(batch, tb),)

    # Cost estimate from the TRUE batch (not padded), exp + reciprocal counted.
    flops = 2 * batch * (state_dim * hidden_dim + hidden_dim * action_dim)
    transcendentals = batch * (action_dim + 1)
    bytes_accessed = itemsize * (
        batch * state_dim                       # x in
        + hidden_dim * (state_dim + 1)          # w1, b1
        + action_dim * (hidden_dim + 1)         # w2, b2
        + batch * action_dim                    # probs out
    )

    # Scoped-VMEM: only matters if tiles get huge (v5e default is 16 MiB).
    vmem_bytes = 4 * (
        2 * tb * (state_dim + action_dim)       # double-buffered xT / outT tiles
        + 2 * tb * hidden_dim                   # hT / e temporaries (upper bound)
        + hidden_dim * (state_dim + 1) + action_dim * (hidden_dim + 1)
    )
    batch_sem = pltpu.CORE_PARALLEL if core_parallel else "parallel"
    compiler_kwargs = dict(dimension_semantics=(batch_sem,))
    if vmem_bytes > 12 * 1024 * 1024:
        compiler_kwargs["vmem_limit_bytes"] = min(2 * vmem_bytes, 48 * 1024 * 1024)

    outT = pl.pallas_call(
        policy_net_kernel,
        out_shape=jax.ShapeDtypeStruct((action_dim, batch), out_dtype),
        grid=grid,
        in_specs=[
            # Activations stream, one batch tile (lanes) per grid step.
            pl.BlockSpec((state_dim, tb), lambda i: (0, i)),
            # Weights / biases: constant block index -> fetched once, resident.
            pl.BlockSpec((hidden_dim, state_dim), lambda i: (0, 0)),
            pl.BlockSpec((hidden_dim, 1), lambda i: (0, 0)),
            pl.BlockSpec((action_dim, hidden_dim), lambda i: (0, 0)),
            pl.BlockSpec((action_dim, 1), lambda i: (0, 0)),
        ],
        out_specs=pl.BlockSpec((action_dim, tb), lambda i: (0, i)),
        compiler_params=pltpu.CompilerParams(**compiler_kwargs),
        cost_estimate=pl.CostEstimate(
            flops=flops,
            transcendentals=transcendentals,
            bytes_accessed=bytes_accessed,
        ),
    )(xT, w1, b1c, w2, b2c)
    return outT.T


def init_params(key, state_dim, hidden_dim, action_dim):
    """PyTorch-nn.Linear-style init: uniform(-1/sqrt(fan_in), 1/sqrt(fan_in)),
    weights stored [out_features, in_features] like PyTorch."""
    k1, k2, k3, k4 = jax.random.split(key, 4)
    bound1 = 1.0 / jnp.sqrt(state_dim)
    bound2 = 1.0 / jnp.sqrt(hidden_dim)
    w1 = jax.random.uniform(k1, (hidden_dim, state_dim), jnp.float32, -bound1, bound1)
    b1 = jax.random.uniform(k2, (hidden_dim,), jnp.float32, -bound1, bound1)
    w2 = jax.random.uniform(k3, (action_dim, hidden_dim), jnp.float32, -bound2, bound2)
    b2 = jax.random.uniform(k4, (action_dim,), jnp.float32, -bound2, bound2)
    return w1, b1, w2, b2


def _reference(x, w1, b1, w2, b2):
    h = jnp.maximum(x @ w1.T + b1, 0.0)
    return jax.nn.softmax(h @ w2.T + b2, axis=-1)


if __name__ == "__main__":
    key = jax.random.PRNGKey(0)
    k_param, k_x_small, k_x_big = jax.random.split(key, 3)

    state_dim, hidden_dim, action_dim = 8, 32, 4
    w1, b1, w2, b2 = init_params(k_param, state_dim, hidden_dim, action_dim)

    # Small batch matching the toy module usage (single full-array block).
    x_small = jax.random.normal(k_x_small, (4, state_dim), jnp.float32)
    probs_small = policy_net_forward(x_small, w1, b1, w2, b2)
    jax.block_until_ready(probs_small)

    # Larger, non-tile-multiple batch: exercises multi-step streaming with
    # resident weights and the ragged (masked) final tile.  batch_tile=128
    # only to force several grid steps at this toy size; production default
    # is 8192 to amortize per-step overhead.
    x_big = jax.random.normal(k_x_big, (300, state_dim), jnp.float32)
    probs_big = policy_net_forward(x_big, w1, b1, w2, b2, batch_tile=128)
    jax.block_until_ready(probs_big)

    # bf16 activation/weight path (halves HBM traffic; f32 accumulation).
    probs_bf16 = policy_net_forward(
        x_big.astype(jnp.bfloat16),
        w1.astype(jnp.bfloat16), b1.astype(jnp.bfloat16),
        w2.astype(jnp.bfloat16), b2.astype(jnp.bfloat16),
        batch_tile=128)
    jax.block_until_ready(probs_bf16)

    # Reference checks.
    ref_small = _reference(x_small, w1, b1, w2, b2)
    ref_big = _reference(x_big, w1, b1, w2, b2)

    assert probs_small.shape == (4, action_dim)
    assert probs_big.shape == (300, action_dim)
    assert probs_bf16.shape == (300, action_dim)
    assert jnp.allclose(probs_small, ref_small, atol=2e-3, rtol=2e-3)
    assert jnp.allclose(probs_big, ref_big, atol=2e-3, rtol=2e-3)
    assert jnp.allclose(jnp.sum(probs_small, axis=-1), 1.0, atol=1e-4)
    assert jnp.allclose(jnp.sum(probs_big, axis=-1), 1.0, atol=1e-4)
    assert jnp.allclose(probs_bf16.astype(jnp.float32), ref_big, atol=3e-2, rtol=3e-2)
    assert jnp.allclose(jnp.sum(probs_bf16.astype(jnp.float32), axis=-1), 1.0, atol=2e-2)

    print("KERNEL_OK")
</pallas_src>

<mosaic_0001>
module attributes {stable_mosaic.version = 11 : i64} {
  func.func @policy_net_kernel(%arg0: i32, %arg1: memref<8x4xf32, #tpu.memory_space<vmem>>, %arg2: memref<32x8xf32, #tpu.memory_space<vmem>>, %arg3: memref<32x1xf32, #tpu.memory_space<vmem>>, %arg4: memref<4x32xf32, #tpu.memory_space<vmem>>, %arg5: memref<4x1xf32, #tpu.memory_space<vmem>>, %arg6: memref<4x4xf32, #tpu.memory_space<vmem>>) attributes {dimension_semantics = [#tpu.dimension_semantics<parallel>], iteration_bounds = array<i64: 1>, scalar_prefetch = 0 : i64, scratch_operands = 0 : i64, tpu.core_type = #tpu.core_type<tc>, window_params = [{transform_indices = @transform_0, window_bounds = array<i64: 8, 4>}, {pipeline_mode = #tpu.pipeline_mode<synchronous>, transform_indices = @transform_1, window_bounds = array<i64: 32, 8>}, {pipeline_mode = #tpu.pipeline_mode<synchronous>, transform_indices = @transform_2, window_bounds = array<i64: 32, 1>}, {pipeline_mode = #tpu.pipeline_mode<synchronous>, transform_indices = @transform_3, window_bounds = array<i64: 4, 32>}, {pipeline_mode = #tpu.pipeline_mode<synchronous>, transform_indices = @transform_4, window_bounds = array<i64: 4, 1>}, {transform_indices = @transform_5, window_bounds = array<i64: 4, 4>}]} {
    %c0 = arith.constant 0 : index
    %c0_0 = arith.constant 0 : index
    %0 = vector.load %arg2[%c0, %c0_0] : memref<32x8xf32, #tpu.memory_space<vmem>>, vector<32x8xf32>
    %c0_1 = arith.constant 0 : index
    %c0_2 = arith.constant 0 : index
    %1 = vector.load %arg1[%c0_1, %c0_2] : memref<8x4xf32, #tpu.memory_space<vmem>>, vector<8x4xf32>
    %cst = arith.constant dense<0.000000e+00> : vector<32x4xf32>
    %2 = tpu.matmul %0, %1, %cst {dimension_numbers = #tpu.dot_dimension_numbers<[1], [0], [0], [1], [0, 0, 1, 1], [], []>} : vector<32x8xf32>, vector<8x4xf32>, vector<32x4xf32> -> vector<32x4xf32>
    %c0_3 = arith.constant 0 : index
    %c0_4 = arith.constant 0 : index
    %3 = vector.load %arg3[%c0_3, %c0_4] : memref<32x1xf32, #tpu.memory_space<vmem>>, vector<32x1xf32>
    %4 = vector.broadcast %3 : vector<32x1xf32> to vector<32x4xf32>
    %5 = arith.addf %2, %4 : vector<32x4xf32>
    %cst_5 = arith.constant 0.000000e+00 : f32
    %6 = vector.broadcast %cst_5 : f32 to vector<32x4xf32>
    %7 = arith.maximumf %5, %6 : vector<32x4xf32>
    %c0_6 = arith.constant 0 : index
    %c0_7 = arith.constant 0 : index
    %8 = vector.load %arg4[%c0_6, %c0_7] : memref<4x32xf32, #tpu.memory_space<vmem>>, vector<4x32xf32>
    %cst_8 = arith.constant dense<0.000000e+00> : vector<4x4xf32>
    %9 = tpu.matmul %8, %7, %cst_8 {dimension_numbers = #tpu.dot_dimension_numbers<[1], [0], [0], [1], [0, 0, 1, 1], [], []>} : vector<4x32xf32>, vector<32x4xf32>, vector<4x4xf32> -> vector<4x4xf32>
    %c0_9 = arith.constant 0 : index
    %c0_10 = arith.constant 0 : index
    %10 = vector.load %arg5[%c0_9, %c0_10] : memref<4x1xf32, #tpu.memory_space<vmem>>, vector<4x1xf32>
    %11 = vector.broadcast %10 : vector<4x1xf32> to vector<4x4xf32>
    %12 = arith.addf %9, %11 : vector<4x4xf32>
    %cst_11 = arith.constant dense<0xFF800000> : vector<4xf32>
    %13 = vector.multi_reduction <maximumf>, %12, %cst_11 [0] : vector<4x4xf32> to vector<4xf32>
    %14 = vector.shape_cast %13 : vector<4xf32> to vector<1x4xf32>
    %15 = vector.broadcast %14 : vector<1x4xf32> to vector<4x4xf32>
    %16 = arith.subf %12, %15 : vector<4x4xf32>
    %17 = math.exp %16 : vector<4x4xf32>
    %cst_12 = arith.constant dense<0.000000e+00> : vector<4xf32>
    %18 = vector.multi_reduction <add>, %17, %cst_12 [0] : vector<4x4xf32> to vector<4xf32>
    %19 = vector.shape_cast %18 : vector<4xf32> to vector<1x4xf32>
    %20 = vector.broadcast %19 : vector<1x4xf32> to vector<4x4xf32>
    %21 = arith.divf %17, %20 : vector<4x4xf32>
    %c0_13 = arith.constant 0 : index
    %c0_14 = arith.constant 0 : index
    %22 = vector.load %arg6[%c0_13, %c0_14] : memref<4x4xf32, #tpu.memory_space<vmem>>, vector<4x4xf32>
    tpu.vector_store %arg6[%c0_13, %c0_14], %21 {strides = array<i32>} : memref<4x4xf32, #tpu.memory_space<vmem>>, vector<4x4xf32>,
    return
  }
  func.func @transform_0(%arg0: i32) -> (i32, i32) {
    %c0_i32 = arith.constant 0 : i32
    %c0_i32_0 = arith.constant 0 : i32
    return %c0_i32, %arg0 : i32, i32
  }
  func.func @transform_1(%arg0: i32) -> (i32, i32) {
    %c0_i32 = arith.constant 0 : i32
    %c0_i32_0 = arith.constant 0 : i32
    %c0_i32_1 = arith.constant 0 : i32
    return %c0_i32, %c0_i32_0 : i32, i32
  }
  func.func @transform_2(%arg0: i32) -> (i32, i32) {
    %c0_i32 = arith.constant 0 : i32
    %c0_i32_0 = arith.constant 0 : i32
    %c0_i32_1 = arith.constant 0 : i32
    return %c0_i32, %c0_i32_0 : i32, i32
  }
  func.func @transform_3(%arg0: i32) -> (i32, i32) {
    %c0_i32 = arith.constant 0 : i32
    %c0_i32_0 = arith.constant 0 : i32
    %c0_i32_1 = arith.constant 0 : i32
    return %c0_i32, %c0_i32_0 : i32, i32
  }
  func.func @transform_4(%arg0: i32) -> (i32, i32) {
    %c0_i32 = arith.constant 0 : i32
    %c0_i32_0 = arith.constant 0 : i32
    %c0_i32_1 = arith.constant 0 : i32
    return %c0_i32, %c0_i32_0 : i32, i32
  }
  func.func @transform_5(%arg0: i32) -> (i32, i32) {
    %c0_i32 = arith.constant 0 : i32
    %c0_i32_0 = arith.constant 0 : i32
    return %c0_i32, %arg0 : i32, i32
  }
}

</mosaic_0001>

<bundles_post_ra>
// kernel: tpu_custom_call.1
= control target key start
LH: loop header
LB: loop body
LE: loop exit
PB: predicated region body
PF: predicated region fallthrough
CT: control target
= control target key end

     0   :  { %vm50_vm0 = vcmask 64512   ;;  %v219_v5 = vmov 0   ;;  %s294_s0 = inlined_call_operand.vmem [shape: f32[8,4], index: 0, kind: input, shape index: {}]   ;;  %s295_s1 = inlined_call_operand.vmem [shape: f32[32,8], index: 1, kind: input, shape index: {}]   ;;  %s296_s2 = inlined_call_operand.vmem [shape: f32[32,1], index: 2, kind: input, shape index: {}]   ;;  %s297_s3 = inlined_call_operand.vmem [shape: f32[4,32], index: 3, kind: input, shape index: {}]   ;;  %s298_s4 = inlined_call_operand.vmem [shape: f32[4,1], index: 4, kind: input, shape index: {}]   ;;  %s299_s5 = inlined_call_operand.hbm [shape: f32[4,4], index: 5, kind: output, shape index: {}]  }
   0x1   :  { %v25_v0 = vld [vmem:[%s294_s0] sm:$0xff]  ;;  %v22_v1 = vld [vmem:[%s295_s1 + $0x8] sm:$0xff]  ;;  %v24_v2 = vld [vmem:[%s295_s1 + $0x18] sm:$0xff]  ;;  %186 = vset.pattern.permute.xlu0 %v219_v5 }
   0x2   :  { %182 = vmatpush.msra.mxu2 %v25_v0  ;;  %183 = vmatpush.msra.mxu3 %v25_v0  ;;  %v29_v3 = vld [vmem:[%s296_s2 + $0x18] sm:$0xff]  ;;  %v21_v4 = vld [vmem:[%s295_s1] sm:$0xff]  ;;  %v27_v6 = vld [vmem:[%s296_s2 + $0x8] sm:$0xff] }
   0x3   :  { %178 = vmatmul.msk.f32.vlgmr.msra.gmra.mxu2 %vm50_vm0, %v22_v1  ;;  %180 = vmatmul.msk.f32.vlgmr.msra.gmra.mxu3 %vm50_vm0, %v24_v2 }
   0x4   :  { %78 = vmatpush.msra.mxu0 %v25_v0 }
   0x5   :  { %10 = vsyncpa [#allocation3], 0  ;;  %47 = vperm.xlu0 %186, %v29_v3   ;;  %177 = vmatmul.msk.f32.vlgmr.msra.gmra.mxu0 %vm50_vm0, %v21_v4  ;;  %v23_v7 = vld [vmem:[%s295_s1 + $0x10] sm:$0xff]  ;;  %v26_v9 = vld [vmem:[%s296_s2] sm:$0xff]  ;;  %vm103_vm1 = vcmask 261120   ;;  %vm127_vm2 = vcmask 27648  }
   0x6   :  { %187 = vset.pattern.permute.xlu1 %v219_v5  ;;  %188 = vset.pattern.permute.xlu2 %v219_v5  ;;  %v28_v8 = vld [vmem:[%s296_s2 + $0x10] sm:$0xff]  ;;  %v97_v10 = vld [vmem:[%s298_s4] sm:$0xf]  ;;  %s168_s14 = sshll.u32 %s299_s5, 4  ;;  %s169_s14 = int_to_ptr.hbm [resolvable:$true] %s168_s14 }
   0x7   :  { %37 = vperm.xlu1 %187, %v27_v6   ;;  %100 = vperm.xlu2 %188, %v97_v10   ;;  %v96_v27 = vld [vmem:[%s297_s3] sm:$0xf]  ;;  %s220_s3 = smov [#allocation2]  }
   0x8   :  { %s166_s4 = sshll.u32 %s220_s3, 4  ;;  %s167_s4 = int_to_ptr.vmem [resolvable:$true] %s166_s4 }
   0xb   :  { %179 = vmatmul.msk.f32.gmra.mxu2 %vm50_vm0, %v23_v7 }
   0xd   :  { %42 = vperm.xlu0 %186, %v28_v8  }
   0xf   :  { %32 = vperm.xlu1 %187, %v26_v9  }
  0x61   :  { %v101_v28 = vpop.permute.xlu2 %100 }
  0x77   :  { %v48_v11 = vpop.permute.xlu0 %47 }
  0x79   :  { %v38_v12 = vpop.permute.xlu1 %37 }
  0x7f   :  { %v43_v17 = vpop.permute.xlu0 %42 }
  0x81   :  { %v33_v18 = vpop.permute.xlu1 %32 }
  0x82   :  { %v80_v19 = vpop.f32.mrf.mxu0 }
  0x83   :  { %v81_v23 = vadd.f32 %v80_v19, %v33_v18 }
  0x85   :  { %v92_v26 = vmax.f32 %v81_v23, 0.0 }
  0x86   :  { %v83_v13 = vpop.f32.mrf.mxu2  ;;  %v89_v14 = vpop.f32.mrf.mxu3 }
  0x87   :  { %v90_v15 = vadd.f32 %v89_v14, %v48_v11  ;;  %v84_v21 = vadd.f32 %v83_v13, %v38_v12 }
  0x89   :  { %v95_v16 = vmax.f32 %v90_v15, 0.0  ;;  %v93_v25 = vmax.f32 %v84_v21, 0.0 }
  0x8b   :  { %119 = vmatpush.msra.mxu1 %v95_v16 }
  0x8e   :  { %v86_v20 = vpop.f32.mrf.mxu2 }
  0x8f   :  { %v87_v22 = vadd.f32 %v86_v20, %v43_v17 }
  0x91   :  { %v94_v24 = vmax.f32 %v87_v22, 0.0 }
  0x93   :  { %120 = vmatpush.msra.mxu1 %v94_v24 }
  0x95   :  { %121 = vmatpush.msra.mxu1 %v93_v25 }
  0x97   :  { %122 = vmatpush.msra.mxu1 %v92_v26 }
  0x98   :  { %181 = vmatmul.msk.f32.vlgmr.msra.gmra.mxu1 %vm103_vm1, %v96_v27 }
 0x115   :  { %v124_v29 = vpop.f32.mrf.mxu1 }
 0x116   :  { %v125_v30 = vadd.f32 %v124_v29, %v101_v28 }
 0x118   :  { %v128_v31 = vsel %vm127_vm2, %v125_v30, -inf }
 0x119   :  { %v129_v32 = vrot.slane %v128_v31, 4 }
 0x11b   :  { %v130_v33 = vmax.f32 %v128_v31, %v129_v32 }
 0x11d   :  { %v131_v34 = vrot.slane %v130_v33, 2 }
 0x11f   :  { %v132_v35 = vmax.f32 %v130_v33, %v131_v34 }
 0x121   :  { %v133_v36 = vrot.slane %v132_v35, 1 }
 0x123   :  { %v134_v37 = vmax.f32 %v132_v35, %v133_v36 }
 0x125   :  { %v135_v38 = vsub.f32 %v125_v30, %v134_v37 }
 0x127   :  { %v136_v39 = vmul.f32 1.442695, %v135_v38 }
 0x129   :  { %189 = vpow2.f32 %v136_v39 }
 0x12f   :  { %v190_v40 = vpop.eup %189 }
 0x130   :  { %v138_v41 = vsel %vm127_vm2, %v190_v40, 0.0 }
 0x131   :  { %v139_v42 = vrot.slane %v138_v41, 4 }
 0x133   :  { %v140_v43 = vadd.f32 %v139_v42, %v138_v41 }
 0x135   :  { %v141_v44 = vrot.slane %v140_v43, 2 }
 0x137   :  { %v142_v45 = vadd.f32 %v141_v44, %v140_v43 }
 0x139   :  { %v143_v46 = vrot.slane %v142_v45, 1 }
 0x13b   :  { %v144_v47 = vadd.f32 %v143_v46, %v142_v45 }
 0x13d   :  { %191 = vrcp.f32 %v144_v47  ;;  %v156_v51 = vand.u32 2147483648, %v144_v47  ;;  %v154_v53 = vand.u32 2147483647, %v144_v47  ;;  %vm150_vm4 = vweird.f32 %v144_v47 }
 0x13f   :  { %v157_v55 = vor.u32 1.1754944e-38, %v156_v51  ;;  %vm155_vm6 = vcmp.eq.f32.partialorder %v154_v53, 8.507059e+37 }
 0x143   :  { %v192_v48 = vpop.eup %191 }
 0x144   :  { %v146_v49 = vmul.f32 %v192_v48, %v144_v47  ;;  %vm151_vm3 = vweird.f32 %v192_v48 }
 0x145   :  { %vm152_vm5 = vmor %vm150_vm4, %vm151_vm3 }
 0x146   :  { %v147_v50 = vsub.f32 1.0, %v146_v49 }
 0x148   :  { %v148_v52 = vmul.f32 %v192_v48, %v147_v50 }
 0x14a   :  { %v149_v54 = vadd.f32 %v192_v48, %v148_v52 }
 0x14c   :  { %v153_v56 = vsel %vm152_vm5, %v192_v48, %v149_v54 }
 0x14d   :  { %v158_v57 = vsel %vm155_vm6, %v157_v55, %v153_v56 }
 0x14e   :  { %v159_v58 = vmul.f32 %v190_v40, %v158_v57 }
 0x150   :  { %160 = vst.msk [vmem:[#allocation2] sm:$0xf] %vm127_vm2, %v159_v58 }
 0x151   :  { %171 = dma.vmem_to_hbm [thread:$0]  %s167_s4, 64, %s169_s14, [#allocation3]  }
 0x152   :  { %217 = dma.done.wait [#allocation3], 64  }
 0x153   :  { %218 = vsyncadd [#allocation3], 4294967232 }
 0x154   :  { %176 = vsyncpa [#allocation3], 1 }

</bundles_post_ra>
